<compile_context>
chip_gen: v5e
topology: v5e:2x2
jax: 0.10.0
libtpu: 0.0.40
codegen_flags: <defaults>
</compile_context>

<pallas_src>
import math
from functools import partial

import jax
import jax.numpy as jnp
from jax.experimental import pallas as pl
from jax.experimental.pallas import tpu as pltpu


# ---------------------------------------------------------------------------
# Pallas kernel: GEMM + (BN-folded) bias + optional ReLU + optional residual
# ---------------------------------------------------------------------------
def _gemm_bias_act_kernel(*refs, relu, has_residual):
    if has_residual:
        a_ref, w_ref, b_ref, r_ref, o_ref = refs
    else:
        a_ref, w_ref, b_ref, o_ref = refs
        r_ref = None

    # Single MXU matmul over the full (kh*kw*Cin) contraction; f32 accumulate.
    acc = jnp.dot(a_ref[...], w_ref[...], preferred_element_type=jnp.float32)
    acc = acc + b_ref[...]                      # (tm, TN) + (1, TN)
    if relu:
        acc = jnp.maximum(acc, 0.0)
    if has_residual:                            # residual added AFTER ReLU,
        acc = acc + r_ref[...].astype(jnp.float32)  # matching the module order
    o_ref[...] = acc.astype(o_ref.dtype)


def _round_up(v, m):
    return -(-v // m) * m


def _pallas_conv_gemm(a, w, bias, residual, *, relu, out_dtype):
    """a: (rows, K) bf16 im2col patches; w: (K, Cout) bf16 BN-folded weights."""
    rows, k_dim = a.shape
    cout = w.shape[-1]

    # Cout tile: 256 fills the v6e/v7x MXU; 128 when Cout fits one lane group.
    tn = 256 if _round_up(cout, 128) >= 256 else 128
    cout_p = _round_up(cout, tn)

    # Row tile: large (amortizes ~0.35us/step), bounded so the A tile stays
    # ~<=2 MiB bf16 (double-buffered footprint comfortably under the limit).
    tm = max(8, min(1024, (2 * 1024 * 1024) // max(2 * k_dim, 1)))
    tm = max(8, (tm // 8) * 8)
    rows8 = _round_up(rows, 8)
    if tm >= rows8:
        tm = rows8
    rows_p = _round_up(rows, tm)

    if rows_p != rows:
        a = jnp.pad(a, ((0, rows_p - rows), (0, 0)))
    if cout_p != cout:
        w = jnp.pad(w, ((0, 0), (0, cout_p - cout)))
        bias = jnp.pad(bias, ((0, cout_p - cout),))
    bias2 = bias.reshape(1, cout_p).astype(jnp.float32)

    args = [a, w, bias2]
    in_specs = [
        # A tile: re-fetched per (j, i); only cout_p//tn passes over A total.
        pl.BlockSpec((tm, k_dim), lambda j, i: (i, 0)),
        # Folded weights: full K x TN, index depends only on j  -> resident
        # in VMEM across the entire row-tile sweep (no per-M-tile re-DMA).
        pl.BlockSpec((k_dim, tn), lambda j, i: (0, j)),
        pl.BlockSpec((1, tn), lambda j, i: (0, j)),
    ]
    if residual is not None:
        r = jnp.pad(residual.astype(jnp.bfloat16),
                    ((0, rows_p - rows), (0, cout_p - cout)))
        args.append(r)
        in_specs.append(pl.BlockSpec((tm, tn), lambda j, i: (i, j)))

    grid = (cout_p // tn, rows_p // tm)   # j outer (weight-resident), i inner

    res_bytes = rows_p * cout_p * 2 if residual is not None else 0
    cost = pl.CostEstimate(
        flops=2 * rows_p * k_dim * cout_p,
        transcendentals=0,
        bytes_accessed=int((cout_p // tn) * rows_p * k_dim * 2
                           + k_dim * cout_p * 2 + cout_p * 4 + res_bytes
                           + rows_p * cout_p * jnp.dtype(out_dtype).itemsize),
    )

    out = pl.pallas_call(
        partial(_gemm_bias_act_kernel, relu=relu,
                has_residual=residual is not None),
        out_shape=jax.ShapeDtypeStruct((rows_p, cout_p), out_dtype),
        grid=grid,
        in_specs=in_specs,
        out_specs=pl.BlockSpec((tm, tn), lambda j, i: (i, j)),
        compiler_params=pltpu.CompilerParams(
            dimension_semantics=("parallel", "parallel"),
            # Explicit scoped-VMEM budget: safe on v5e/v6e (128 MiB physical)
            # and within v7x's 64 MiB; our double-buffered footprint is well
            # below this.
            vmem_limit_bytes=32 * 1024 * 1024),
        cost_estimate=cost,
    )(*args)

    if rows_p != rows or cout_p != cout:
        out = out[:rows, :cout]
    return out


# ---------------------------------------------------------------------------
# Conv + BN (+ReLU) (+fused residual) wrapper (ConvNormAct equivalent)
# ---------------------------------------------------------------------------
def conv_bn_act(x, w, bn, *, stride, padding, relu=True, residual=None,
                out_dtype=jnp.bfloat16):
    """x: NHWC; w: PyTorch layout (Cout, Cin, KH, KW). Returns NHWC."""
    n, h, wd, cin = x.shape
    cout, cin_w, kh, kw = w.shape
    assert cin_w == cin

    # Fold eval-mode BatchNorm into the weights (scale) and a bias vector.
    scale = bn["gamma"] * jax.lax.rsqrt(bn["var"] + 1e-5)
    bias = bn["beta"] - bn["mean"] * scale
    w_f = w.astype(jnp.float32) * scale[:, None, None, None]

    ho = (h + 2 * padding - kh) // stride + 1
    wo = (wd + 2 * padding - kw) // stride + 1
    rows = n * ho * wo

    xb = x.astype(jnp.bfloat16)
    if kh == 1 and kw == 1 and padding == 0:
        patches = xb[:, :(ho - 1) * stride + 1:stride,
                     :(wo - 1) * stride + 1:stride, :]
    else:
        xp = jnp.pad(xb, ((0, 0), (padding, padding), (padding, padding),
                          (0, 0)))
        cols = []
        for di in range(kh):
            for dj in range(kw):
                cols.append(jax.lax.slice(
                    xp, (0, di, dj, 0),
                    (n, di + (ho - 1) * stride + 1,
                     dj + (wo - 1) * stride + 1, cin),
                    (1, stride, stride, 1)))
        patches = jnp.concatenate(cols, axis=-1)      # (N, Ho, Wo, kh*kw*Cin)
    patches = patches.reshape(rows, kh * kw * cin)

    # (Cout, Cin, KH, KW) -> (KH, KW, Cin, Cout) -> (KH*KW*Cin, Cout);
    # tap ordering matches the patch concatenation above.
    wk = jnp.transpose(w_f, (2, 3, 1, 0)).reshape(kh * kw * cin, cout)
    wk = wk.astype(jnp.bfloat16)

    res = residual.reshape(rows, cout) if residual is not None else None

    out = _pallas_conv_gemm(patches, wk, bias.astype(jnp.float32), res,
                            relu=relu, out_dtype=out_dtype)
    return out.reshape(n, ho, wo, cout)


# ---------------------------------------------------------------------------
# ResBlock forward
# ---------------------------------------------------------------------------
def resblock_forward(x_nchw, params):
    if params.get("dropout", 0.0) != 0.0:
        # TODO(synk): training-mode dropout not implemented (p=0.0 path only).
        raise NotImplementedError("dropout > 0.0 not implemented")

    x = jnp.transpose(x_nchw, (0, 2, 3, 1))            # NCHW -> NHWC
    s = params["stride"]

    out = conv_bn_act(x, params["conv1_w"], params["bn1"], stride=s,
                      padding=1, relu=True, out_dtype=jnp.bfloat16)
    out = conv_bn_act(out, params["conv2_w"], params["bn2"], stride=1,
                      padding=1, relu=True, out_dtype=jnp.bfloat16)

    if params["downsample"] is not None:
        identity = conv_bn_act(x, params["downsample"]["w"],
                               params["downsample"]["bn"], stride=s,
                               padding=0, relu=False, out_dtype=jnp.bfloat16)
    else:
        identity = x.astype(jnp.bfloat16)

    # conv3 + bn3 + relu, then (Identity dropout), then residual add --
    # all fused in one Pallas kernel; order matches the module exactly.
    out = conv_bn_act(out, params["conv3_w"], params["bn3"], stride=1,
                      padding=1, relu=True, residual=identity,
                      out_dtype=jnp.bfloat16)

    # Upcast only at the final NHWC -> NCHW transpose (bf16 writeback above).
    return jnp.transpose(out, (0, 3, 1, 2)).astype(jnp.float32)


# ---------------------------------------------------------------------------
# Deterministic parameter init (Conv2d default-style init, fresh BN stats)
# ---------------------------------------------------------------------------
def _conv_init(key, cout, cin, kh, kw):
    fan_in = cin * kh * kw
    bound = 1.0 / math.sqrt(fan_in)
    return jax.random.uniform(key, (cout, cin, kh, kw), jnp.float32,
                              -bound, bound)


def _bn_params(c):
    return {
        "gamma": jnp.ones((c,), jnp.float32),
        "beta": jnp.zeros((c,), jnp.float32),
        "mean": jnp.zeros((c,), jnp.float32),
        "var": jnp.ones((c,), jnp.float32),
    }


def init_resblock_params(key, inplanes, ouplanes, stride=1, dropout=0.0,
                         with_downsample=True):
    k1, k2, k3, k4 = jax.random.split(key, 4)
    mdplanes = ouplanes
    return {
        "stride": stride,
        "dropout": dropout,
        "conv1_w": _conv_init(k1, mdplanes, inplanes, 3, 3),
        "bn1": _bn_params(mdplanes),
        "conv2_w": _conv_init(k2, mdplanes, mdplanes, 3, 3),
        "bn2": _bn_params(mdplanes),
        "conv3_w": _conv_init(k3, ouplanes, mdplanes, 3, 3),
        "bn3": _bn_params(ouplanes),
        "downsample": (
            {"w": _conv_init(k4, ouplanes, inplanes, 1, 1),
             "bn": _bn_params(ouplanes)}
            if with_downsample else None),
    }


# ---------------------------------------------------------------------------
if __name__ == "__main__":
    key = jax.random.PRNGKey(0)
    kx, kp = jax.random.split(key)

    batch, inplanes, ouplanes, spatial, stride = 2, 4, 8, 16, 2
    x = jax.random.normal(kx, (batch, inplanes, spatial, spatial), jnp.float32)
    params = init_resblock_params(kp, inplanes, ouplanes, stride=stride,
                                  dropout=0.0, with_downsample=True)

    fwd = jax.jit(lambda inp: resblock_forward(inp, params))
    out = fwd(x)
    jax.block_until_ready(out)

    expected = (batch, ouplanes, spatial // stride, spatial // stride)
    assert out.shape == expected, out.shape
    assert bool(jnp.all(jnp.isfinite(out))), "non-finite output"
    print("KERNEL_OK")
</pallas_src>

<mosaic_0001>
module attributes {stable_mosaic.version = 11 : i64} {
  func.func @_gemm_bias_act_kernel(%arg0: i32, %arg1: i32, %arg2: memref<128x36xbf16, #tpu.memory_space<vmem>>, %arg3: memref<36x128xbf16, #tpu.memory_space<vmem>>, %arg4: memref<1x128xf32, #tpu.memory_space<vmem>>, %arg5: memref<128x128xbf16, #tpu.memory_space<vmem>>) attributes {dimension_semantics = [#tpu.dimension_semantics<parallel>, #tpu.dimension_semantics<parallel>], iteration_bounds = array<i64: 1, 1>, scalar_prefetch = 0 : i64, scratch_operands = 0 : i64, tpu.core_type = #tpu.core_type<tc>, window_params = [{transform_indices = @transform_0, window_bounds = array<i64: 128, 36>}, {transform_indices = @transform_1, window_bounds = array<i64: 36, 128>}, {transform_indices = @transform_2, window_bounds = array<i64: 1, 128>}, {transform_indices = @transform_3, window_bounds = array<i64: 128, 128>}]} {
    %c0 = arith.constant 0 : index
    %c0_0 = arith.constant 0 : index
    %0 = vector.load %arg2[%c0, %c0_0] : memref<128x36xbf16, #tpu.memory_space<vmem>>, vector<128x36xbf16>
    %c0_1 = arith.constant 0 : index
    %c0_2 = arith.constant 0 : index
    %1 = vector.load %arg3[%c0_1, %c0_2] : memref<36x128xbf16, #tpu.memory_space<vmem>>, vector<36x128xbf16>
    %cst = arith.constant dense<0.000000e+00> : vector<128x128xf32>
    %2 = tpu.matmul %0, %1, %cst {dimension_numbers = #tpu.dot_dimension_numbers<[1], [0], [0], [1], [0, 0, 1, 1], [], []>} : vector<128x36xbf16>, vector<36x128xbf16>, vector<128x128xf32> -> vector<128x128xf32>
    %c0_3 = arith.constant 0 : index
    %c0_4 = arith.constant 0 : index
    %3 = vector.load %arg4[%c0_3, %c0_4] : memref<1x128xf32, #tpu.memory_space<vmem>>, vector<1x128xf32>
    %4 = vector.broadcast %3 : vector<1x128xf32> to vector<128x128xf32>
    %5 = arith.addf %2, %4 : vector<128x128xf32>
    %cst_5 = arith.constant 0.000000e+00 : f32
    %6 = vector.broadcast %cst_5 : f32 to vector<128x128xf32>
    %7 = arith.maximumf %5, %6 : vector<128x128xf32>
    %8 = arith.truncf %7 : vector<128x128xf32> to vector<128x128xbf16>
    %c0_6 = arith.constant 0 : index
    %c0_7 = arith.constant 0 : index
    %9 = vector.load %arg5[%c0_6, %c0_7] : memref<128x128xbf16, #tpu.memory_space<vmem>>, vector<128x128xbf16>
    tpu.vector_store %arg5[%c0_6, %c0_7], %8 {strides = array<i32>} : memref<128x128xbf16, #tpu.memory_space<vmem>>, vector<128x128xbf16>,
    return
  }
  func.func @transform_0(%arg0: i32, %arg1: i32) -> (i32, i32) {
    %c0_i32 = arith.constant 0 : i32
    %c0_i32_0 = arith.constant 0 : i32
    return %arg1, %c0_i32 : i32, i32
  }
  func.func @transform_1(%arg0: i32, %arg1: i32) -> (i32, i32) {
    %c0_i32 = arith.constant 0 : i32
    %c0_i32_0 = arith.constant 0 : i32
    return %c0_i32, %arg0 : i32, i32
  }
  func.func @transform_2(%arg0: i32, %arg1: i32) -> (i32, i32) {
    %c0_i32 = arith.constant 0 : i32
    %c0_i32_0 = arith.constant 0 : i32
    return %c0_i32, %arg0 : i32, i32
  }
  func.func @transform_3(%arg0: i32, %arg1: i32) -> (i32, i32) {
    %c0_i32 = arith.constant 0 : i32
    return %arg1, %arg0 : i32, i32
  }
}

module attributes {stable_mosaic.version = 11 : i64} {
  func.func @_gemm_bias_act_kernel(%arg0: i32, %arg1: i32, %arg2: memref<128x4xbf16, #tpu.memory_space<vmem>>, %arg3: memref<4x128xbf16, #tpu.memory_space<vmem>>, %arg4: memref<1x128xf32, #tpu.memory_space<vmem>>, %arg5: memref<128x128xbf16, #tpu.memory_space<vmem>>) attributes {dimension_semantics = [#tpu.dimension_semantics<parallel>, #tpu.dimension_semantics<parallel>], iteration_bounds = array<i64: 1, 1>, scalar_prefetch = 0 : i64, scratch_operands = 0 : i64, tpu.core_type = #tpu.core_type<tc>, window_params = [{transform_indices = @transform_0, window_bounds = array<i64: 128, 4>}, {transform_indices = @transform_1, window_bounds = array<i64: 4, 128>}, {transform_indices = @transform_2, window_bounds = array<i64: 1, 128>}, {transform_indices = @transform_3, window_bounds = array<i64: 128, 128>}]} {
    %c0 = arith.constant 0 : index
    %c0_0 = arith.constant 0 : index
    %0 = vector.load %arg2[%c0, %c0_0] : memref<128x4xbf16, #tpu.memory_space<vmem>>, vector<128x4xbf16>
    %c0_1 = arith.constant 0 : index
    %c0_2 = arith.constant 0 : index
    %1 = vector.load %arg3[%c0_1, %c0_2] : memref<4x128xbf16, #tpu.memory_space<vmem>>, vector<4x128xbf16>
    %cst = arith.constant dense<0.000000e+00> : vector<128x128xf32>
    %2 = tpu.matmul %0, %1, %cst {dimension_numbers = #tpu.dot_dimension_numbers<[1], [0], [0], [1], [0, 0, 1, 1], [], []>} : vector<128x4xbf16>, vector<4x128xbf16>, vector<128x128xf32> -> vector<128x128xf32>
    %c0_3 = arith.constant 0 : index
    %c0_4 = arith.constant 0 : index
    %3 = vector.load %arg4[%c0_3, %c0_4] : memref<1x128xf32, #tpu.memory_space<vmem>>, vector<1x128xf32>
    %4 = vector.broadcast %3 : vector<1x128xf32> to vector<128x128xf32>
    %5 = arith.addf %2, %4 : vector<128x128xf32>
    %6 = arith.truncf %5 : vector<128x128xf32> to vector<128x128xbf16>
    %c0_5 = arith.constant 0 : index
    %c0_6 = arith.constant 0 : index
    %7 = vector.load %arg5[%c0_5, %c0_6] : memref<128x128xbf16, #tpu.memory_space<vmem>>, vector<128x128xbf16>
    tpu.vector_store %arg5[%c0_5, %c0_6], %6 {strides = array<i32>} : memref<128x128xbf16, #tpu.memory_space<vmem>>, vector<128x128xbf16>,
    return
  }
  func.func @transform_0(%arg0: i32, %arg1: i32) -> (i32, i32) {
    %c0_i32 = arith.constant 0 : i32
    %c0_i32_0 = arith.constant 0 : i32
    return %arg1, %c0_i32 : i32, i32
  }
  func.func @transform_1(%arg0: i32, %arg1: i32) -> (i32, i32) {
    %c0_i32 = arith.constant 0 : i32
    %c0_i32_0 = arith.constant 0 : i32
    return %c0_i32, %arg0 : i32, i32
  }
  func.func @transform_2(%arg0: i32, %arg1: i32) -> (i32, i32) {
    %c0_i32 = arith.constant 0 : i32
    %c0_i32_0 = arith.constant 0 : i32
    return %c0_i32, %arg0 : i32, i32
  }
  func.func @transform_3(%arg0: i32, %arg1: i32) -> (i32, i32) {
    %c0_i32 = arith.constant 0 : i32
    return %arg1, %arg0 : i32, i32
  }
}

module attributes {stable_mosaic.version = 11 : i64} {
  func.func @_gemm_bias_act_kernel(%arg0: i32, %arg1: i32, %arg2: memref<128x72xbf16, #tpu.memory_space<vmem>>, %arg3: memref<72x128xbf16, #tpu.memory_space<vmem>>, %arg4: memref<1x128xf32, #tpu.memory_space<vmem>>, %arg5: memref<128x128xbf16, #tpu.memory_space<vmem>>) attributes {dimension_semantics = [#tpu.dimension_semantics<parallel>, #tpu.dimension_semantics<parallel>], iteration_bounds = array<i64: 1, 1>, scalar_prefetch = 0 : i64, scratch_operands = 0 : i64, tpu.core_type = #tpu.core_type<tc>, window_params = [{transform_indices = @transform_0, window_bounds = array<i64: 128, 72>}, {transform_indices = @transform_1, window_bounds = array<i64: 72, 128>}, {transform_indices = @transform_2, window_bounds = array<i64: 1, 128>}, {transform_indices = @transform_3, window_bounds = array<i64: 128, 128>}]} {
    %c0 = arith.constant 0 : index
    %c0_0 = arith.constant 0 : index
    %0 = vector.load %arg2[%c0, %c0_0] : memref<128x72xbf16, #tpu.memory_space<vmem>>, vector<128x72xbf16>
    %c0_1 = arith.constant 0 : index
    %c0_2 = arith.constant 0 : index
    %1 = vector.load %arg3[%c0_1, %c0_2] : memref<72x128xbf16, #tpu.memory_space<vmem>>, vector<72x128xbf16>
    %cst = arith.constant dense<0.000000e+00> : vector<128x128xf32>
    %2 = tpu.matmul %0, %1, %cst {dimension_numbers = #tpu.dot_dimension_numbers<[1], [0], [0], [1], [0, 0, 1, 1], [], []>} : vector<128x72xbf16>, vector<72x128xbf16>, vector<128x128xf32> -> vector<128x128xf32>
    %c0_3 = arith.constant 0 : index
    %c0_4 = arith.constant 0 : index
    %3 = vector.load %arg4[%c0_3, %c0_4] : memref<1x128xf32, #tpu.memory_space<vmem>>, vector<1x128xf32>
    %4 = vector.broadcast %3 : vector<1x128xf32> to vector<128x128xf32>
    %5 = arith.addf %2, %4 : vector<128x128xf32>
    %cst_5 = arith.constant 0.000000e+00 : f32
    %6 = vector.broadcast %cst_5 : f32 to vector<128x128xf32>
    %7 = arith.maximumf %5, %6 : vector<128x128xf32>
    %8 = arith.truncf %7 : vector<128x128xf32> to vector<128x128xbf16>
    %c0_6 = arith.constant 0 : index
    %c0_7 = arith.constant 0 : index
    %9 = vector.load %arg5[%c0_6, %c0_7] : memref<128x128xbf16, #tpu.memory_space<vmem>>, vector<128x128xbf16>
    tpu.vector_store %arg5[%c0_6, %c0_7], %8 {strides = array<i32>} : memref<128x128xbf16, #tpu.memory_space<vmem>>, vector<128x128xbf16>,
    return
  }
  func.func @transform_0(%arg0: i32, %arg1: i32) -> (i32, i32) {
    %c0_i32 = arith.constant 0 : i32
    %c0_i32_0 = arith.constant 0 : i32
    return %arg1, %c0_i32 : i32, i32
  }
  func.func @transform_1(%arg0: i32, %arg1: i32) -> (i32, i32) {
    %c0_i32 = arith.constant 0 : i32
    %c0_i32_0 = arith.constant 0 : i32
    return %c0_i32, %arg0 : i32, i32
  }
  func.func @transform_2(%arg0: i32, %arg1: i32) -> (i32, i32) {
    %c0_i32 = arith.constant 0 : i32
    %c0_i32_0 = arith.constant 0 : i32
    return %c0_i32, %arg0 : i32, i32
  }
  func.func @transform_3(%arg0: i32, %arg1: i32) -> (i32, i32) {
    %c0_i32 = arith.constant 0 : i32
    return %arg1, %arg0 : i32, i32
  }
}

module attributes {stable_mosaic.version = 11 : i64} {
  func.func @_gemm_bias_act_kernel(%arg0: i32, %arg1: i32, %arg2: memref<128x72xbf16, #tpu.memory_space<vmem>>, %arg3: memref<72x128xbf16, #tpu.memory_space<vmem>>, %arg4: memref<1x128xf32, #tpu.memory_space<vmem>>, %arg5: memref<128x128xbf16, #tpu.memory_space<vmem>>, %arg6: memref<128x128xbf16, #tpu.memory_space<vmem>>) attributes {dimension_semantics = [#tpu.dimension_semantics<parallel>, #tpu.dimension_semantics<parallel>], iteration_bounds = array<i64: 1, 1>, scalar_prefetch = 0 : i64, scratch_operands = 0 : i64, tpu.core_type = #tpu.core_type<tc>, window_params = [{transform_indices = @transform_0, window_bounds = array<i64: 128, 72>}, {transform_indices = @transform_1, window_bounds = array<i64: 72, 128>}, {transform_indices = @transform_2, window_bounds = array<i64: 1, 128>}, {transform_indices = @transform_3, window_bounds = array<i64: 128, 128>}, {transform_indices = @transform_4, window_bounds = array<i64: 128, 128>}]} {
    %c0 = arith.constant 0 : index
    %c0_0 = arith.constant 0 : index
    %0 = vector.load %arg2[%c0, %c0_0] : memref<128x72xbf16, #tpu.memory_space<vmem>>, vector<128x72xbf16>
    %c0_1 = arith.constant 0 : index
    %c0_2 = arith.constant 0 : index
    %1 = vector.load %arg3[%c0_1, %c0_2] : memref<72x128xbf16, #tpu.memory_space<vmem>>, vector<72x128xbf16>
    %cst = arith.constant dense<0.000000e+00> : vector<128x128xf32>
    %2 = tpu.matmul %0, %1, %cst {dimension_numbers = #tpu.dot_dimension_numbers<[1], [0], [0], [1], [0, 0, 1, 1], [], []>} : vector<128x72xbf16>, vector<72x128xbf16>, vector<128x128xf32> -> vector<128x128xf32>
    %c0_3 = arith.constant 0 : index
    %c0_4 = arith.constant 0 : index
    %3 = vector.load %arg4[%c0_3, %c0_4] : memref<1x128xf32, #tpu.memory_space<vmem>>, vector<1x128xf32>
    %4 = vector.broadcast %3 : vector<1x128xf32> to vector<128x128xf32>
    %5 = arith.addf %2, %4 : vector<128x128xf32>
    %cst_5 = arith.constant 0.000000e+00 : f32
    %6 = vector.broadcast %cst_5 : f32 to vector<128x128xf32>
    %7 = arith.maximumf %5, %6 : vector<128x128xf32>
    %c0_6 = arith.constant 0 : index
    %c0_7 = arith.constant 0 : index
    %8 = vector.load %arg5[%c0_6, %c0_7] : memref<128x128xbf16, #tpu.memory_space<vmem>>, vector<128x128xbf16>
    %9 = arith.extf %8 : vector<128x128xbf16> to vector<128x128xf32>
    %10 = arith.addf %7, %9 : vector<128x128xf32>
    %11 = arith.truncf %10 : vector<128x128xf32> to vector<128x128xbf16>
    %c0_8 = arith.constant 0 : index
    %c0_9 = arith.constant 0 : index
    %12 = vector.load %arg6[%c0_8, %c0_9] : memref<128x128xbf16, #tpu.memory_space<vmem>>, vector<128x128xbf16>
    tpu.vector_store %arg6[%c0_8, %c0_9], %11 {strides = array<i32>} : memref<128x128xbf16, #tpu.memory_space<vmem>>, vector<128x128xbf16>,
    return
  }
  func.func @transform_0(%arg0: i32, %arg1: i32) -> (i32, i32) {
    %c0_i32 = arith.constant 0 : i32
    %c0_i32_0 = arith.constant 0 : i32
    return %arg1, %c0_i32 : i32, i32
  }
  func.func @transform_1(%arg0: i32, %arg1: i32) -> (i32, i32) {
    %c0_i32 = arith.constant 0 : i32
    %c0_i32_0 = arith.constant 0 : i32
    return %c0_i32, %arg0 : i32, i32
  }
  func.func @transform_2(%arg0: i32, %arg1: i32) -> (i32, i32) {
    %c0_i32 = arith.constant 0 : i32
    %c0_i32_0 = arith.constant 0 : i32
    return %c0_i32, %arg0 : i32, i32
  }
  func.func @transform_3(%arg0: i32, %arg1: i32) -> (i32, i32) {
    %c0_i32 = arith.constant 0 : i32
    return %arg1, %arg0 : i32, i32
  }
  func.func @transform_4(%arg0: i32, %arg1: i32) -> (i32, i32) {
    %c0_i32 = arith.constant 0 : i32
    return %arg1, %arg0 : i32, i32
  }
}

</mosaic_0001>

<bundles_post_ra>
// kernel: _lambda_.6
= control target key start
LH: loop header
LB: loop body
LE: loop exit
PB: predicated region body
PF: predicated region fallthrough
CT: control target
= control target key end

     0   :  { %vm101_vm0 = vcmask 1041408   ;;  %vm76_vm1 = vcmask 31744   ;;  %s371_s1 = inlined_call_operand.vmem [shape: bf16[4,128], index: 1, kind: input, shape index: {}]   ;;  %s372_s0 = inlined_call_operand.vmem [shape: bf16[128,4], index: 0, kind: input, shape index: {}]   ;;  %s373_s2 = inlined_call_operand.vmem [shape: f32[1,128], index: 2, kind: input, shape index: {}]   ;;  %s374_s3 = inlined_call_operand.vmem [shape: bf16[128,128], index: 3, kind: output, shape index: {}]  }
   0x1   :  { %v31_v0 = vld [vmem:[%s371_s1] sm:$0x3]  ;;  %v232_v3 = vld [vmem:[%s372_s0 + $0x10] sm:$0xff]  ;;  %v231_v6 = vld [vmem:[%s372_s0 + $0x8] sm:$0xff] }
   0x2   :  { %v103_v1 = vsel %vm101_vm0, %v31_v0, 0  ;;  %v230_v2 = vld [vmem:[%s372_s0] sm:$0xff]  ;;  %v236_v5 = vld [vmem:[%s372_s0 + $0x30] sm:$0xff]  ;;  %v233_v7 = vld [vmem:[%s372_s0 + $0x18] sm:$0xff] }
   0x3   :  { %112 = vmatpush.bf16.msra.mxu0 %v103_v1  ;;  %285 = vmatpush.bf16.msra.mxu1 %v103_v1  ;;  %v234_v4 = vld [vmem:[%s372_s0 + $0x20] sm:$0xff]  ;;  %v235_v8 = vld [vmem:[%s372_s0 + $0x28] sm:$0xff]  ;;  %v237_v9 = vld [vmem:[%s372_s0 + $0x38] sm:$0xff] }
   0x4   :  { %286 = vmatpush.bf16.msra.mxu2 %v103_v1  ;;  %287 = vmatpush.bf16.msra.mxu3 %v103_v1  ;;  %v288_v12 = vld [vmem:[%s373_s2] ss:$0 sm:$0xff] }
   0x6   :  { %222 = vmatmul.msk.bf16.vlgmr.msra.gmra.mxu0 %vm76_vm1, %v230_v2  ;;  %224 = vmatmul.msk.bf16.vlgmr.msra.gmra.mxu1 %vm76_vm1, %v232_v3 }
   0x7   :  { %226 = vmatmul.msk.bf16.vlgmr.msra.gmra.mxu2 %vm76_vm1, %v234_v4  ;;  %228 = vmatmul.msk.bf16.vlgmr.msra.gmra.mxu3 %vm76_vm1, %v236_v5 }
  0x16   :  { %223 = vmatmul.msk.bf16.gmra.mxu0 %vm76_vm1, %v231_v6  ;;  %225 = vmatmul.msk.bf16.gmra.mxu1 %vm76_vm1, %v233_v7 }
  0x17   :  { %227 = vmatmul.msk.bf16.gmra.mxu2 %vm76_vm1, %v235_v8  ;;  %229 = vmatmul.msk.bf16.gmra.mxu3 %vm76_vm1, %v237_v9 }
  0x83   :  { %v114_v10 = vpop.f32.mrf.mxu0  ;;  %v124_v11 = vpop.f32.mrf.mxu1 }
  0x84   :  { %v115_v17 = vadd.f32 %v288_v12, %v114_v10  ;;  %v125_v18 = vadd.f32 %v288_v12, %v124_v11 }
  0x8a   :  { %v134_v13 = vpop.f32.mrf.mxu2  ;;  %v144_v14 = vpop.f32.mrf.mxu3 }
  0x8b   :  { %v116_v15 = vpop.f32.mrf.mxu0  ;;  %v126_v16 = vpop.f32.mrf.mxu1  ;;  %v135_v25 = vadd.f32 %v288_v12, %v134_v13  ;;  %v145_v26 = vadd.f32 %v288_v12, %v144_v14 }
  0x8c   :  { %v117_v19 = vadd.f32 %v288_v12, %v116_v15  ;;  %v127_v20 = vadd.f32 %v288_v12, %v126_v16 }
  0x8e   :  { %v241_v21 = vpack.c.bf16 %v117_v19, %v115_v17  ;;  %v251_v22 = vpack.c.bf16 %v127_v20, %v125_v18 }
  0x90   :  { %242 = vst [vmem:[%s374_s3] sm:$0xff] %v241_v21  }
  0x91   :  { %279 = vst [vmem:[%s374_s3 + $0x10] sm:$0xff] %v251_v22  }
  0x92   :  { %v136_v23 = vpop.f32.mrf.mxu2  ;;  %v146_v24 = vpop.f32.mrf.mxu3 }
  0x93   :  { %v137_v27 = vadd.f32 %v288_v12, %v136_v23  ;;  %v147_v28 = vadd.f32 %v288_v12, %v146_v24  ;;  %v119_v29 = vpop.f32.mrf.mxu0  ;;  %v129_v30 = vpop.f32.mrf.mxu1 }
  0x94   :  { %v120_v37 = vadd.f32 %v288_v12, %v119_v29  ;;  %v130_v38 = vadd.f32 %v288_v12, %v129_v30 }
  0x95   :  { %v261_v31 = vpack.c.bf16 %v137_v27, %v135_v25  ;;  %v271_v32 = vpack.c.bf16 %v147_v28, %v145_v26 }
  0x97   :  { %281 = vst [vmem:[%s374_s3 + $0x20] sm:$0xff] %v261_v31  }
  0x98   :  { %283 = vst [vmem:[%s374_s3 + $0x30] sm:$0xff] %v271_v32  }
  0x9a   :  { %v139_v33 = vpop.f32.mrf.mxu2  ;;  %v149_v34 = vpop.f32.mrf.mxu3 }
  0x9b   :  { %v121_v35 = vpop.f32.mrf.mxu0  ;;  %v131_v36 = vpop.f32.mrf.mxu1  ;;  %v140_v45 = vadd.f32 %v288_v12, %v139_v33  ;;  %v150_v46 = vadd.f32 %v288_v12, %v149_v34 }
  0x9c   :  { %v122_v39 = vadd.f32 %v288_v12, %v121_v35  ;;  %v132_v40 = vadd.f32 %v288_v12, %v131_v36 }
  0x9e   :  { %v246_v41 = vpack.c.bf16 %v122_v39, %v120_v37  ;;  %v256_v42 = vpack.c.bf16 %v132_v40, %v130_v38 }
  0xa0   :  { %278 = vst [vmem:[%s374_s3 + $0x8] sm:$0xff] %v246_v41  }
  0xa1   :  { %280 = vst [vmem:[%s374_s3 + $0x18] sm:$0xff] %v256_v42  }
  0xa2   :  { %v141_v43 = vpop.f32.mrf.mxu2  ;;  %v151_v44 = vpop.f32.mrf.mxu3 }
  0xa3   :  { %v142_v47 = vadd.f32 %v288_v12, %v141_v43  ;;  %v152_v48 = vadd.f32 %v288_v12, %v151_v44 }
  0xa5   :  { %v266_v49 = vpack.c.bf16 %v142_v47, %v140_v45  ;;  %v276_v50 = vpack.c.bf16 %v152_v48, %v150_v46 }
  0xa7   :  { %282 = vst [vmem:[%s374_s3 + $0x28] sm:$0xff] %v266_v49  }
  0xa8   :  { %284 = vst [vmem:[%s374_s3 + $0x38] sm:$0xff] %v276_v50  }

// kernel: _lambda_.4
= control target key start
LH: loop header
LB: loop body
LE: loop exit
PB: predicated region body
PF: predicated region fallthrough
CT: control target
= control target key end

     0   :  { %vm120_vm0 = vcmask 1041408   ;;  %vm95_vm1 = vcmask 293888   ;;  %s428_s1 = inlined_call_operand.vmem [shape: bf16[36,128], index: 1, kind: input, shape index: {}]   ;;  %s429_s2 = inlined_call_operand.vmem [shape: f32[1,128], index: 2, kind: input, shape index: {}]   ;;  %s430_s0 = inlined_call_operand.vmem [shape: bf16[128,36], index: 0, kind: input, shape index: {}]   ;;  %s431_s3 = inlined_call_operand.vmem [shape: bf16[128,128], index: 3, kind: output, shape index: {}]  }
   0x1   :  { %v35_v0 = vld [vmem:[%s428_s1 + $0x10] sm:$0x3]  ;;  %v282_v4 = vld [vmem:[%s428_s1 + $0x8] sm:$0xff]  ;;  %v281_v5 = vld [vmem:[%s428_s1] sm:$0xff] }
   0x2   :  { %v89_v1 = vunpack.c.l.b16 %v35_v0  ;;  %v273_v6 = vld [vmem:[%s430_s0] sm:$0xff]  ;;  %v275_v7 = vld [vmem:[%s430_s0 + $0x10] sm:$0xff]  ;;  %v274_v10 = vld [vmem:[%s430_s0 + $0x8] sm:$0xff] }
   0x3   :  { %v277_v8 = vld [vmem:[%s430_s0 + $0x20] sm:$0xff]  ;;  %v279_v9 = vld [vmem:[%s430_s0 + $0x30] sm:$0xff]  ;;  %v276_v11 = vld [vmem:[%s430_s0 + $0x18] sm:$0xff] }
   0x4   :  { %v92_v2 = vpack.c.b16 %v89_v1, %v89_v1  ;;  %v278_v12 = vld [vmem:[%s430_s0 + $0x28] sm:$0xff]  ;;  %v280_v13 = vld [vmem:[%s430_s0 + $0x38] sm:$0xff]  ;;  %v339_v16 = vld [vmem:[%s429_s2] ss:$0 sm:$0xff] }
   0x6   :  { %v122_v3 = vsel %vm120_vm0, %v92_v2, 0 }
   0x7   :  { %129 = vmatpush.bf16.msra.mxu0 %v122_v3  ;;  %330 = vmatpush.bf16.msra.mxu1 %v122_v3 }
   0x8   :  { %331 = vmatpush.bf16.msra.mxu2 %v122_v3  ;;  %332 = vmatpush.bf16.msra.mxu3 %v122_v3 }
   0xb   :  { %130 = vmatpush.bf16.msra.mxu0 %v282_v4  ;;  %333 = vmatpush.bf16.msra.mxu1 %v282_v4 }
   0xc   :  { %334 = vmatpush.bf16.msra.mxu2 %v282_v4  ;;  %335 = vmatpush.bf16.msra.mxu3 %v282_v4 }
   0xf   :  { %131 = vmatpush.bf16.msra.mxu0 %v281_v5  ;;  %336 = vmatpush.bf16.msra.mxu1 %v281_v5 }
  0x10   :  { %337 = vmatpush.bf16.msra.mxu2 %v281_v5  ;;  %338 = vmatpush.bf16.msra.mxu3 %v281_v5 }
  0x12   :  { %265 = vmatmul.msk.bf16.vlgmr.msra.gmra.mxu0 %vm95_vm1, %v273_v6  ;;  %267 = vmatmul.msk.bf16.vlgmr.msra.gmra.mxu1 %vm95_vm1, %v275_v7 }
  0x13   :  { %269 = vmatmul.msk.bf16.vlgmr.msra.gmra.mxu2 %vm95_vm1, %v277_v8  ;;  %271 = vmatmul.msk.bf16.vlgmr.msra.gmra.mxu3 %vm95_vm1, %v279_v9 }
  0x22   :  { %266 = vmatmul.msk.bf16.gmra.mxu0 %vm95_vm1, %v274_v10  ;;  %268 = vmatmul.msk.bf16.gmra.mxu1 %vm95_vm1, %v276_v11 }
  0x23   :  { %270 = vmatmul.msk.bf16.gmra.mxu2 %vm95_vm1, %v278_v12  ;;  %272 = vmatmul.msk.bf16.gmra.mxu3 %vm95_vm1, %v280_v13 }
  0x8f   :  { %v133_v14 = vpop.f32.mrf.mxu0  ;;  %v143_v15 = vpop.f32.mrf.mxu1 }
  0x90   :  { %v134_v17 = vadd.f32 %v339_v16, %v133_v14  ;;  %v144_v18 = vadd.f32 %v339_v16, %v143_v15 }
  0x92   :  { %v173_v25 = vmax.f32 %v134_v17, 0.0  ;;  %v177_v26 = vmax.f32 %v144_v18, 0.0 }
  0x96   :  { %v153_v19 = vpop.f32.mrf.mxu2  ;;  %v163_v20 = vpop.f32.mrf.mxu3 }
  0x97   :  { %v135_v21 = vpop.f32.mrf.mxu0  ;;  %v145_v22 = vpop.f32.mrf.mxu1  ;;  %v154_v31 = vadd.f32 %v339_v16, %v153_v19  ;;  %v164_v32 = vadd.f32 %v339_v16, %v163_v20 }
  0x98   :  { %v136_v23 = vadd.f32 %v339_v16, %v135_v21  ;;  %v146_v24 = vadd.f32 %v339_v16, %v145_v22 }
  0x99   :  { %v181_v39 = vmax.f32 %v154_v31, 0.0  ;;  %v185_v40 = vmax.f32 %v164_v32, 0.0 }
  0x9a   :  { %v174_v27 = vmax.f32 %v136_v23, 0.0  ;;  %v178_v28 = vmax.f32 %v146_v24, 0.0 }
  0x9c   :  { %v286_v29 = vpack.c.bf16 %v174_v27, %v173_v25  ;;  %v296_v30 = vpack.c.bf16 %v178_v28, %v177_v26 }
  0x9e   :  { %287 = vst [vmem:[%s431_s3] sm:$0xff] %v286_v29   ;;  %v155_v33 = vpop.f32.mrf.mxu2  ;;  %v165_v34 = vpop.f32.mrf.mxu3 }
  0x9f   :  { %324 = vst [vmem:[%s431_s3 + $0x10] sm:$0xff] %v296_v30   ;;  %v156_v35 = vadd.f32 %v339_v16, %v155_v33  ;;  %v166_v36 = vadd.f32 %v339_v16, %v165_v34  ;;  %v138_v37 = vpop.f32.mrf.mxu0  ;;  %v148_v38 = vpop.f32.mrf.mxu1 }
  0xa0   :  { %v139_v45 = vadd.f32 %v339_v16, %v138_v37  ;;  %v149_v46 = vadd.f32 %v339_v16, %v148_v38 }
  0xa1   :  { %v182_v41 = vmax.f32 %v156_v35, 0.0  ;;  %v186_v42 = vmax.f32 %v166_v36, 0.0 }
  0xa2   :  { %v175_v53 = vmax.f32 %v139_v45, 0.0  ;;  %v179_v54 = vmax.f32 %v149_v46, 0.0 }
  0xa3   :  { %v306_v43 = vpack.c.bf16 %v182_v41, %v181_v39  ;;  %v316_v44 = vpack.c.bf16 %v186_v42, %v185_v40 }
  0xa5   :  { %326 = vst [vmem:[%s431_s3 + $0x20] sm:$0xff] %v306_v43  }
  0xa6   :  { %328 = vst [vmem:[%s431_s3 + $0x30] sm:$0xff] %v316_v44   ;;  %v158_v47 = vpop.f32.mrf.mxu2  ;;  %v168_v48 = vpop.f32.mrf.mxu3 }
  0xa7   :  { %v140_v49 = vpop.f32.mrf.mxu0  ;;  %v150_v50 = vpop.f32.mrf.mxu1  ;;  %v159_v59 = vadd.f32 %v339_v16, %v158_v47  ;;  %v169_v60 = vadd.f32 %v339_v16, %v168_v48 }
  0xa8   :  { %v141_v51 = vadd.f32 %v339_v16, %v140_v49  ;;  %v151_v52 = vadd.f32 %v339_v16, %v150_v50 }
  0xa9   :  { %v183_v1 = vmax.f32 %v159_v59, 0.0  ;;  %v187_v2 = vmax.f32 %v169_v60, 0.0 }
  0xaa   :  { %v176_v55 = vmax.f32 %v141_v51, 0.0  ;;  %v180_v56 = vmax.f32 %v151_v52, 0.0 }
  0xac   :  { %v291_v57 = vpack.c.bf16 %v176_v55, %v175_v53  ;;  %v301_v58 = vpack.c.bf16 %v180_v56, %v179_v54 }
  0xae   :  { %323 = vst [vmem:[%s431_s3 + $0x8] sm:$0xff] %v291_v57   ;;  %v160_v61 = vpop.f32.mrf.mxu2  ;;  %v170_v62 = vpop.f32.mrf.mxu3 }
  0xaf   :  { %325 = vst [vmem:[%s431_s3 + $0x18] sm:$0xff] %v301_v58   ;;  %v161_v63 = vadd.f32 %v339_v16, %v160_v61  ;;  %v171_v0 = vadd.f32 %v339_v16, %v170_v62 }
  0xb1   :  { %v184_v3 = vmax.f32 %v161_v63, 0.0  ;;  %v188_v4 = vmax.f32 %v171_v0, 0.0 }
  0xb3   :  { %v311_v5 = vpack.c.bf16 %v184_v3, %v183_v1  ;;  %v321_v6 = vpack.c.bf16 %v188_v4, %v187_v2 }
  0xb5   :  { %327 = vst [vmem:[%s431_s3 + $0x28] sm:$0xff] %v311_v5  }
  0xb6   :  { %329 = vst [vmem:[%s431_s3 + $0x38] sm:$0xff] %v321_v6  }

// kernel: _lambda_.5
= control target key start
LH: loop header
LB: loop body
LE: loop exit
PB: predicated region body
PF: predicated region fallthrough
CT: control target
= control target key end

     0   :  { %vm136_vm0 = vcmask 1043456   ;;  %vm111_vm1 = vcmask 588800   ;;  %s466_s1 = inlined_call_operand.vmem [shape: bf16[72,128], index: 1, kind: input, shape index: {}]   ;;  %s467_s2 = inlined_call_operand.vmem [shape: f32[1,128], index: 2, kind: input, shape index: {}]   ;;  %s468_s0 = inlined_call_operand.vmem [shape: bf16[128,72], index: 0, kind: input, shape index: {}]   ;;  %s469_s3 = inlined_call_operand.vmem [shape: bf16[128,128], index: 3, kind: output, shape index: {}]  }
   0x1   :  { %v39_v0 = vld [vmem:[%s466_s1 + $0x20] sm:$0xf]  ;;  %v308_v4 = vld [vmem:[%s466_s1 + $0x18] sm:$0xff]  ;;  %v307_v5 = vld [vmem:[%s466_s1 + $0x10] sm:$0xff] }
   0x2   :  { %v101_v1 = vunpack.c.l.b16 %v39_v0  ;;  %v306_v6 = vld [vmem:[%s466_s1 + $0x8] sm:$0xff]  ;;  %v305_v7 = vld [vmem:[%s466_s1] sm:$0xff]  ;;  %v299_v9 = vld [vmem:[%s468_s0 + $0x10] sm:$0xff] }
   0x3   :  { %v297_v8 = vld [vmem:[%s468_s0] sm:$0xff]  ;;  %v303_v11 = vld [vmem:[%s468_s0 + $0x30] sm:$0xff]  ;;  %v298_v12 = vld [vmem:[%s468_s0 + $0x8] sm:$0xff] }
   0x4   :  { %v106_v2 = vpack.c.b16 %v101_v1, %v101_v1  ;;  %v301_v10 = vld [vmem:[%s468_s0 + $0x20] sm:$0xff]  ;;  %v300_v13 = vld [vmem:[%s468_s0 + $0x18] sm:$0xff]  ;;  %v302_v14 = vld [vmem:[%s468_s0 + $0x28] sm:$0xff] }
   0x5   :  { %v304_v15 = vld [vmem:[%s468_s0 + $0x38] sm:$0xff]  ;;  %v371_v18 = vld [vmem:[%s467_s2] ss:$0 sm:$0xff] }
   0x6   :  { %v138_v3 = vsel %vm136_vm0, %v106_v2, 0 }
   0x7   :  { %143 = vmatpush.bf16.msra.mxu0 %v138_v3  ;;  %356 = vmatpush.bf16.msra.mxu1 %v138_v3 }
   0x8   :  { %357 = vmatpush.bf16.msra.mxu2 %v138_v3  ;;  %358 = vmatpush.bf16.msra.mxu3 %v138_v3 }
   0xb   :  { %144 = vmatpush.bf16.msra.mxu0 %v308_v4  ;;  %359 = vmatpush.bf16.msra.mxu1 %v308_v4 }
   0xc   :  { %360 = vmatpush.bf16.msra.mxu2 %v308_v4  ;;  %361 = vmatpush.bf16.msra.mxu3 %v308_v4 }
   0xf   :  { %145 = vmatpush.bf16.msra.mxu0 %v307_v5  ;;  %362 = vmatpush.bf16.msra.mxu1 %v307_v5 }
  0x10   :  { %363 = vmatpush.bf16.msra.mxu2 %v307_v5  ;;  %364 = vmatpush.bf16.msra.mxu3 %v307_v5 }
  0x13   :  { %146 = vmatpush.bf16.msra.mxu0 %v306_v6  ;;  %365 = vmatpush.bf16.msra.mxu1 %v306_v6 }
  0x14   :  { %366 = vmatpush.bf16.msra.mxu2 %v306_v6  ;;  %367 = vmatpush.bf16.msra.mxu3 %v306_v6 }
  0x17   :  { %147 = vmatpush.bf16.msra.mxu0 %v305_v7  ;;  %368 = vmatpush.bf16.msra.mxu1 %v305_v7 }
  0x18   :  { %369 = vmatpush.bf16.msra.mxu2 %v305_v7  ;;  %370 = vmatpush.bf16.msra.mxu3 %v305_v7 }
  0x1a   :  { %289 = vmatmul.msk.bf16.vlgmr.msra.gmra.mxu0 %vm111_vm1, %v297_v8  ;;  %291 = vmatmul.msk.bf16.vlgmr.msra.gmra.mxu1 %vm111_vm1, %v299_v9 }
  0x1b   :  { %293 = vmatmul.msk.bf16.vlgmr.msra.gmra.mxu2 %vm111_vm1, %v301_v10  ;;  %295 = vmatmul.msk.bf16.vlgmr.msra.gmra.mxu3 %vm111_vm1, %v303_v11 }
  0x2a   :  { %290 = vmatmul.msk.bf16.gmra.mxu0 %vm111_vm1, %v298_v12  ;;  %292 = vmatmul.msk.bf16.gmra.mxu1 %vm111_vm1, %v300_v13 }
  0x2b   :  { %294 = vmatmul.msk.bf16.gmra.mxu2 %vm111_vm1, %v302_v14  ;;  %296 = vmatmul.msk.bf16.gmra.mxu3 %vm111_vm1, %v304_v15 }
  0x97   :  { %v149_v16 = vpop.f32.mrf.mxu0  ;;  %v159_v17 = vpop.f32.mrf.mxu1 }
  0x98   :  { %v150_v19 = vadd.f32 %v371_v18, %v149_v16  ;;  %v160_v20 = vadd.f32 %v371_v18, %v159_v17 }
  0x9a   :  { %v189_v27 = vmax.f32 %v150_v19, 0.0  ;;  %v193_v28 = vmax.f32 %v160_v20, 0.0 }
  0x9e   :  { %v169_v21 = vpop.f32.mrf.mxu2  ;;  %v179_v22 = vpop.f32.mrf.mxu3 }
  0x9f   :  { %v151_v23 = vpop.f32.mrf.mxu0  ;;  %v161_v24 = vpop.f32.mrf.mxu1  ;;  %v170_v33 = vadd.f32 %v371_v18, %v169_v21  ;;  %v180_v34 = vadd.f32 %v371_v18, %v179_v22 }
  0xa0   :  { %v152_v25 = vadd.f32 %v371_v18, %v151_v23  ;;  %v162_v26 = vadd.f32 %v371_v18, %v161_v24 }
  0xa1   :  { %v197_v41 = vmax.f32 %v170_v33, 0.0  ;;  %v201_v42 = vmax.f32 %v180_v34, 0.0 }
  0xa2   :  { %v190_v29 = vmax.f32 %v152_v25, 0.0  ;;  %v194_v30 = vmax.f32 %v162_v26, 0.0 }
  0xa4   :  { %v312_v31 = vpack.c.bf16 %v190_v29, %v189_v27  ;;  %v322_v32 = vpack.c.bf16 %v194_v30, %v193_v28 }
  0xa6   :  { %313 = vst [vmem:[%s469_s3] sm:$0xff] %v312_v31   ;;  %v171_v35 = vpop.f32.mrf.mxu2  ;;  %v181_v36 = vpop.f32.mrf.mxu3 }
  0xa7   :  { %350 = vst [vmem:[%s469_s3 + $0x10] sm:$0xff] %v322_v32   ;;  %v172_v37 = vadd.f32 %v371_v18, %v171_v35  ;;  %v182_v38 = vadd.f32 %v371_v18, %v181_v36  ;;  %v154_v39 = vpop.f32.mrf.mxu0  ;;  %v164_v40 = vpop.f32.mrf.mxu1 }
  0xa8   :  { %v155_v47 = vadd.f32 %v371_v18, %v154_v39  ;;  %v165_v48 = vadd.f32 %v371_v18, %v164_v40 }
  0xa9   :  { %v198_v43 = vmax.f32 %v172_v37, 0.0  ;;  %v202_v44 = vmax.f32 %v182_v38, 0.0 }
  0xaa   :  { %v191_v55 = vmax.f32 %v155_v47, 0.0  ;;  %v195_v56 = vmax.f32 %v165_v48, 0.0 }
  0xab   :  { %v332_v45 = vpack.c.bf16 %v198_v43, %v197_v41  ;;  %v342_v46 = vpack.c.bf16 %v202_v44, %v201_v42 }
  0xad   :  { %352 = vst [vmem:[%s469_s3 + $0x20] sm:$0xff] %v332_v45  }
  0xae   :  { %354 = vst [vmem:[%s469_s3 + $0x30] sm:$0xff] %v342_v46   ;;  %v174_v49 = vpop.f32.mrf.mxu2  ;;  %v184_v50 = vpop.f32.mrf.mxu3 }
  0xaf   :  { %v156_v51 = vpop.f32.mrf.mxu0  ;;  %v166_v52 = vpop.f32.mrf.mxu1  ;;  %v175_v61 = vadd.f32 %v371_v18, %v174_v49  ;;  %v185_v62 = vadd.f32 %v371_v18, %v184_v50 }
  0xb0   :  { %v157_v53 = vadd.f32 %v371_v18, %v156_v51  ;;  %v167_v54 = vadd.f32 %v371_v18, %v166_v52 }
  0xb1   :  { %v199_v3 = vmax.f32 %v175_v61, 0.0  ;;  %v203_v4 = vmax.f32 %v185_v62, 0.0 }
  0xb2   :  { %v192_v57 = vmax.f32 %v157_v53, 0.0  ;;  %v196_v58 = vmax.f32 %v167_v54, 0.0 }
  0xb4   :  { %v317_v59 = vpack.c.bf16 %v192_v57, %v191_v55  ;;  %v327_v60 = vpack.c.bf16 %v196_v58, %v195_v56 }
  0xb6   :  { %349 = vst [vmem:[%s469_s3 + $0x8] sm:$0xff] %v317_v59   ;;  %v176_v63 = vpop.f32.mrf.mxu2  ;;  %v186_v0 = vpop.f32.mrf.mxu3 }
  0xb7   :  { %351 = vst [vmem:[%s469_s3 + $0x18] sm:$0xff] %v327_v60   ;;  %v177_v1 = vadd.f32 %v371_v18, %v176_v63  ;;  %v187_v2 = vadd.f32 %v371_v18, %v186_v0 }
  0xb9   :  { %v200_v5 = vmax.f32 %v177_v1, 0.0  ;;  %v204_v6 = vmax.f32 %v187_v2, 0.0 }
  0xbb   :  { %v337_v7 = vpack.c.bf16 %v200_v5, %v199_v3  ;;  %v347_v8 = vpack.c.bf16 %v204_v6, %v203_v4 }
  0xbd   :  { %353 = vst [vmem:[%s469_s3 + $0x28] sm:$0xff] %v337_v7  }
  0xbe   :  { %355 = vst [vmem:[%s469_s3 + $0x38] sm:$0xff] %v347_v8  }

// kernel: _lambda_.7
= control target key start
LH: loop header
LB: loop body
LE: loop exit
PB: predicated region body
PF: predicated region fallthrough
CT: control target
= control target key end

     0   :  { %vm139_vm0 = vcmask 1043456   ;;  %vm114_vm1 = vcmask 588800   ;;  %s603_s1 = inlined_call_operand.vmem [shape: bf16[72,128], index: 1, kind: input, shape index: {}]   ;;  %s604_s2 = inlined_call_operand.vmem [shape: f32[1,128], index: 2, kind: input, shape index: {}]   ;;  %s605_s0 = inlined_call_operand.vmem [shape: bf16[128,72], index: 0, kind: input, shape index: {}]   ;;  %s606_s3 = inlined_call_operand.vmem [shape: bf16[128,128], index: 3, kind: input, shape index: {}]   ;;  %s607_s4 = inlined_call_operand.vmem [shape: bf16[128,128], index: 4, kind: output, shape index: {}]  }
   0x1   :  { %v42_v0 = vld [vmem:[%s603_s1 + $0x20] sm:$0xf]  ;;  %v359_v4 = vld [vmem:[%s603_s1 + $0x18] sm:$0xff]  ;;  %v358_v5 = vld [vmem:[%s603_s1 + $0x10] sm:$0xff] }
   0x2   :  { %v104_v1 = vunpack.c.l.b16 %v42_v0  ;;  %v357_v6 = vld [vmem:[%s603_s1 + $0x8] sm:$0xff]  ;;  %v356_v7 = vld [vmem:[%s603_s1] sm:$0xff]  ;;  %v350_v9 = vld [vmem:[%s605_s0 + $0x10] sm:$0xff] }
   0x3   :  { %v348_v8 = vld [vmem:[%s605_s0] sm:$0xff]  ;;  %v354_v11 = vld [vmem:[%s605_s0 + $0x30] sm:$0xff]  ;;  %v349_v12 = vld [vmem:[%s605_s0 + $0x8] sm:$0xff] }
   0x4   :  { %v109_v2 = vpack.c.b16 %v104_v1, %v104_v1  ;;  %v352_v10 = vld [vmem:[%s605_s0 + $0x20] sm:$0xff]  ;;  %v351_v13 = vld [vmem:[%s605_s0 + $0x18] sm:$0xff]  ;;  %v353_v14 = vld [vmem:[%s605_s0 + $0x28] sm:$0xff] }
   0x5   :  { %v355_v15 = vld [vmem:[%s605_s0 + $0x38] sm:$0xff]  ;;  %v537_v18 = vld [vmem:[%s604_s2] ss:$0 sm:$0xff]  ;;  %v433_v22 = vld [vmem:[%s606_s3 + $0x10] sm:$0xff]  }
   0x6   :  { %v141_v3 = vsel %vm139_vm0, %v109_v2, 0  ;;  %v361_v20 = vld [vmem:[%s606_s3] sm:$0xff]   ;;  %v370_v26 = vunpack.c.l.bf16 %v433_v22  ;;  %v371_v30 = vunpack.c.h.bf16 %v433_v22  ;;  %v437_v36 = vld [vmem:[%s606_s3 + $0x30] sm:$0xff]   ;;  %v432_v2 = vld [vmem:[%s606_s3 + $0x8] sm:$0xff]  }
   0x7   :  { %146 = vmatpush.bf16.msra.mxu0 %v141_v3  ;;  %446 = vmatpush.bf16.msra.mxu1 %v141_v3  ;;  %v362_v25 = vunpack.c.l.bf16 %v361_v20  ;;  %v363_v28 = vunpack.c.h.bf16 %v361_v20  ;;  %v435_v35 = vld [vmem:[%s606_s3 + $0x20] sm:$0xff]   ;;  %v386_v46 = vunpack.c.l.bf16 %v437_v36  ;;  %v387_v52 = vunpack.c.h.bf16 %v437_v36  ;;  %v436_v20 = vld [vmem:[%s606_s3 + $0x28] sm:$0xff]  }
   0x8   :  { %447 = vmatpush.bf16.msra.mxu2 %v141_v3  ;;  %448 = vmatpush.bf16.msra.mxu3 %v141_v3  ;;  %v378_v45 = vunpack.c.l.bf16 %v435_v35  ;;  %v379_v50 = vunpack.c.h.bf16 %v435_v35  ;;  %v383_v35 = vunpack.c.h.bf16 %v436_v20 }
   0xb   :  { %147 = vmatpush.bf16.msra.mxu0 %v359_v4  ;;  %449 = vmatpush.bf16.msra.mxu1 %v359_v4 }
   0xc   :  { %450 = vmatpush.bf16.msra.mxu2 %v359_v4  ;;  %451 = vmatpush.bf16.msra.mxu3 %v359_v4  ;;  %v434_v4 = vld [vmem:[%s606_s3 + $0x18] sm:$0xff]  }
   0xf   :  { %148 = vmatpush.bf16.msra.mxu0 %v358_v5  ;;  %452 = vmatpush.bf16.msra.mxu1 %v358_v5 }
  0x10   :  { %453 = vmatpush.bf16.msra.mxu2 %v358_v5  ;;  %454 = vmatpush.bf16.msra.mxu3 %v358_v5 }
  0x13   :  { %149 = vmatpush.bf16.msra.mxu0 %v357_v6  ;;  %455 = vmatpush.bf16.msra.mxu1 %v357_v6 }
  0x14   :  { %456 = vmatpush.bf16.msra.mxu2 %v357_v6  ;;  %457 = vmatpush.bf16.msra.mxu3 %v357_v6 }
  0x17   :  { %150 = vmatpush.bf16.msra.mxu0 %v356_v7  ;;  %458 = vmatpush.bf16.msra.mxu1 %v356_v7 }
  0x18   :  { %459 = vmatpush.bf16.msra.mxu2 %v356_v7  ;;  %460 = vmatpush.bf16.msra.mxu3 %v356_v7 }
  0x1a   :  { %340 = vmatmul.msk.bf16.vlgmr.msra.gmra.mxu0 %vm114_vm1, %v348_v8  ;;  %342 = vmatmul.msk.bf16.vlgmr.msra.gmra.mxu1 %vm114_vm1, %v350_v9  ;;  %v366_v9 = vunpack.c.l.bf16 %v432_v2 }
  0x1b   :  { %344 = vmatmul.msk.bf16.vlgmr.msra.gmra.mxu2 %vm114_vm1, %v352_v10  ;;  %346 = vmatmul.msk.bf16.vlgmr.msra.gmra.mxu3 %vm114_vm1, %v354_v11  ;;  %v374_v10 = vunpack.c.l.bf16 %v434_v4 }
  0x2a   :  { %341 = vmatmul.msk.bf16.gmra.mxu0 %vm114_vm1, %v349_v12  ;;  %343 = vmatmul.msk.bf16.gmra.mxu1 %vm114_vm1, %v351_v13  ;;  %v367_v12 = vunpack.c.h.bf16 %v432_v2 }
  0x2b   :  { %345 = vmatmul.msk.bf16.gmra.mxu2 %vm114_vm1, %v353_v14  ;;  %347 = vmatmul.msk.bf16.gmra.mxu3 %vm114_vm1, %v355_v15  ;;  %v375_v14 = vunpack.c.h.bf16 %v434_v4 }
  0x97   :  { %v152_v16 = vpop.f32.mrf.mxu0  ;;  %v162_v17 = vpop.f32.mrf.mxu1 }
  0x98   :  { %v153_v19 = vadd.f32 %v537_v18, %v152_v16  ;;  %v163_v21 = vadd.f32 %v537_v18, %v162_v17 }
  0x9a   :  { %v192_v31 = vmax.f32 %v153_v19, 0.0  ;;  %v196_v32 = vmax.f32 %v163_v21, 0.0  ;;  %v438_v21 = vld [vmem:[%s606_s3 + $0x38] sm:$0xff]  }
  0x9c   :  { %v240_v41 = vadd.f32 %v362_v25, %v192_v31  ;;  %v244_v42 = vadd.f32 %v370_v26, %v196_v32  ;;  %v390_v31 = vunpack.c.l.bf16 %v438_v21 }
  0x9e   :  { %v172_v23 = vpop.f32.mrf.mxu2  ;;  %v182_v24 = vpop.f32.mrf.mxu3 }
  0x9f   :  { %v154_v27 = vpop.f32.mrf.mxu0  ;;  %v164_v29 = vpop.f32.mrf.mxu1  ;;  %v173_v39 = vadd.f32 %v537_v18, %v172_v23  ;;  %v183_v40 = vadd.f32 %v537_v18, %v182_v24 }
  0xa0   :  { %v155_v33 = vadd.f32 %v537_v18, %v154_v27  ;;  %v165_v34 = vadd.f32 %v537_v18, %v164_v29 }
  0xa1   :  { %v200_v53 = vmax.f32 %v173_v39, 0.0  ;;  %v204_v54 = vmax.f32 %v183_v40, 0.0 }
  0xa2   :  { %v193_v37 = vmax.f32 %v155_v33, 0.0  ;;  %v197_v38 = vmax.f32 %v165_v34, 0.0 }
  0xa3   :  { %v248_v61 = vadd.f32 %v378_v45, %v200_v53  ;;  %v252_v62 = vadd.f32 %v386_v46, %v204_v54 }
  0xa4   :  { %v241_v43 = vadd.f32 %v363_v28, %v193_v37  ;;  %v245_v44 = vadd.f32 %v371_v30, %v197_v38  ;;  %v382_v30 = vunpack.c.l.bf16 %v436_v20  ;;  %v391_v37 = vunpack.c.h.bf16 %v438_v21 }
  0xa6   :  { %v395_v47 = vpack.c.bf16 %v241_v43, %v240_v41  ;;  %v405_v48 = vpack.c.bf16 %v245_v44, %v244_v42  ;;  %v174_v49 = vpop.f32.mrf.mxu2  ;;  %v184_v51 = vpop.f32.mrf.mxu3 }
  0xa7   :  { %v175_v55 = vadd.f32 %v537_v18, %v174_v49  ;;  %v185_v56 = vadd.f32 %v537_v18, %v184_v51  ;;  %v157_v57 = vpop.f32.mrf.mxu0  ;;  %v167_v58 = vpop.f32.mrf.mxu1 }
  0xa8   :  { %396 = vst [vmem:[%s607_s4] sm:$0xff] %v395_v47   ;;  %v158_v1 = vadd.f32 %v537_v18, %v157_v57  ;;  %v168_v3 = vadd.f32 %v537_v18, %v167_v58 }
  0xa9   :  { %440 = vst [vmem:[%s607_s4 + $0x10] sm:$0xff] %v405_v48   ;;  %v201_v59 = vmax.f32 %v175_v55, 0.0  ;;  %v205_v60 = vmax.f32 %v185_v56, 0.0 }
  0xaa   :  { %v194_v15 = vmax.f32 %v158_v1, 0.0  ;;  %v198_v16 = vmax.f32 %v168_v3, 0.0 }
  0xab   :  { %v249_v63 = vadd.f32 %v379_v50, %v201_v59  ;;  %v253_v0 = vadd.f32 %v387_v52, %v205_v60 }
  0xac   :  { %v242_v26 = vadd.f32 %v366_v9, %v194_v15  ;;  %v246_v27 = vadd.f32 %v374_v10, %v198_v16 }
  0xad   :  { %v415_v5 = vpack.c.bf16 %v249_v63, %v248_v61  ;;  %v425_v6 = vpack.c.bf16 %v253_v0, %v252_v62 }
  0xae   :  { %v177_v7 = vpop.f32.mrf.mxu2  ;;  %v187_v8 = vpop.f32.mrf.mxu3 }
  0xaf   :  { %442 = vst [vmem:[%s607_s4 + $0x20] sm:$0xff] %v415_v5   ;;  %v159_v11 = vpop.f32.mrf.mxu0  ;;  %v169_v13 = vpop.f32.mrf.mxu1  ;;  %v178_v24 = vadd.f32 %v537_v18, %v177_v7  ;;  %v188_v25 = vadd.f32 %v537_v18, %v187_v8 }
  0xb0   :  { %444 = vst [vmem:[%s607_s4 + $0x30] sm:$0xff] %v425_v6   ;;  %v160_v17 = vadd.f32 %v537_v18, %v159_v11  ;;  %v170_v19 = vadd.f32 %v537_v18, %v169_v13 }
  0xb1   :  { %v202_v38 = vmax.f32 %v178_v24, 0.0  ;;  %v206_v39 = vmax.f32 %v188_v25, 0.0 }
  0xb2   :  { %v195_v22 = vmax.f32 %v160_v17, 0.0  ;;  %v199_v23 = vmax.f32 %v170_v19, 0.0 }
  0xb3   :  { %v250_v44 = vadd.f32 %v382_v30, %v202_v38  ;;  %v254_v45 = vadd.f32 %v390_v31, %v206_v39 }
  0xb4   :  { %v243_v28 = vadd.f32 %v367_v12, %v195_v22  ;;  %v247_v29 = vadd.f32 %v375_v14, %v199_v23 }
  0xb6   :  { %v400_v32 = vpack.c.bf16 %v243_v28, %v242_v26  ;;  %v410_v33 = vpack.c.bf16 %v247_v29, %v246_v27  ;;  %v179_v34 = vpop.f32.mrf.mxu2  ;;  %v189_v36 = vpop.f32.mrf.mxu3 }
  0xb7   :  { %v180_v40 = vadd.f32 %v537_v18, %v179_v34  ;;  %v190_v41 = vadd.f32 %v537_v18, %v189_v36 }
  0xb8   :  { %439 = vst [vmem:[%s607_s4 + $0x8] sm:$0xff] %v400_v32  }
  0xb9   :  { %441 = vst [vmem:[%s607_s4 + $0x18] sm:$0xff] %v410_v33   ;;  %v203_v42 = vmax.f32 %v180_v40, 0.0  ;;  %v207_v43 = vmax.f32 %v190_v41, 0.0 }
  0xbb   :  { %v251_v46 = vadd.f32 %v383_v35, %v203_v42  ;;  %v255_v47 = vadd.f32 %v391_v37, %v207_v43 }
  0xbd   :  { %v420_v48 = vpack.c.bf16 %v251_v46, %v250_v44  ;;  %v430_v49 = vpack.c.bf16 %v255_v47, %v254_v45 }
  0xbf   :  { %443 = vst [vmem:[%s607_s4 + $0x28] sm:$0xff] %v420_v48  }
  0xc0   :  { %445 = vst [vmem:[%s607_s4 + $0x38] sm:$0xff] %v430_v49  }

</bundles_post_ra>
